<compile_context>
chip_gen: v5e
topology: v5e:2x2
jax: 0.10.0
libtpu: 0.0.40
codegen_flags: <defaults>
</compile_context>

<pallas_src>
import functools
import math

import jax
import jax.numpy as jnp
from jax.experimental import pallas as pl
from jax.experimental.pallas import tpu as pltpu


def _round_up(x, m):
    return (x + m - 1) // m * m


# Packed accumulator columns: [m_cml, l_cml, t_cml, m_ce, l_ce, t_ce, _, _]
_M_CML, _L_CML, _T_CML, _M_CE, _L_CE, _T_CE = 0, 1, 2, 3, 4, 5


def _pick_tile_c(C, D, tile_b, budget_bytes, max_tile_c):
    """Largest class tile whose double-buffered weight+logits blocks fit budget."""
    step = 256 if C >= 256 else 128
    tc = max(step, min(_round_up(C, step), _round_up(max_tile_c, step)))

    def need(t):  # bf16 weight tile + f32 logits tile, both double-buffered
        return 2 * t * D * 2 + 2 * tile_b * t * 4

    while tc > step and need(tc) > budget_bytes:
        tc -= step
    while tc > 128 and need(tc) > budget_bytes:
        tc -= 128
    return tc


def _fused_loss_kernel(emb_ref, w_ref, logits_ref, lab_ref, rowloss_ref,
                       emb_n_ref, acc_ref, *,
                       s, cos_m, sin_m, m3, use_arcface, lam,
                       c_valid, tile_c, mask_classes):
    ci = pl.program_id(1)
    nc = pl.num_programs(1)

    # ---- per-batch-tile init (first class tile) ------------------------------
    @pl.when(ci == 0)
    def _init():
        e = emb_ref[...].astype(jnp.float32)
        inv = jax.lax.rsqrt(jnp.maximum(jnp.sum(e * e, axis=-1, keepdims=True), 1e-24))
        emb_n_ref[...] = (e * inv).astype(emb_n_ref.dtype)   # cached bf16 MXU operand
        cols = jax.lax.broadcasted_iota(jnp.int32, acc_ref.shape, 1)
        acc_ref[...] = jnp.where((cols == _M_CML) | (cols == _M_CE),
                                 -jnp.inf, 0.0).astype(jnp.float32)

    labels = lab_ref[...]                                    # (TILE_B, 1) int32
    lab_shift = labels - ci * tile_c                         # target col within tile
    row_has_tgt = (lab_shift >= 0) & (lab_shift < tile_c)    # (TILE_B, 1)

    # ---- CombinedMarginLoss logits for this class tile -----------------------
    # Weights arrive pre-normalized bf16; embeddings were normalized at init.
    cos = jax.lax.dot_general(
        emb_n_ref[...], w_ref[...], (((1,), (1,)), ((), ())),
        preferred_element_type=jnp.float32)                  # (TILE_B, TILE_C) f32
    cos = jnp.clip(cos, -1.0, 1.0)

    col = jax.lax.broadcasted_iota(jnp.int32, cos.shape, 1)
    is_tgt = col == lab_shift                                # -1 labels never match
    if mask_classes:
        col_valid = col < (c_valid - ci * tile_c)

    # Margin math confined to the (TILE_B, 1) target column.
    tgt_cos = jnp.sum(jnp.where(is_tgt, cos, 0.0), axis=-1, keepdims=True)
    if use_arcface:
        # cos(arccos(x) + m2) = x*cos(m2) - sqrt(1 - x^2)*sin(m2)
        sin_t = jnp.sqrt(jnp.clip(1.0 - tgt_cos * tgt_cos, 0.0, 1.0))
        tgt_new = tgt_cos * cos_m - sin_t * sin_m
    else:
        # CosFace-style: subtract m3 at the target position.
        tgt_new = tgt_cos - m3

    cml = jnp.where(is_tgt, tgt_new, cos) * s
    if mask_classes:
        cml = jnp.where(col_valid, cml, -1e30)               # mask padded classes

    m_old = acc_ref[:, _M_CML:_M_CML + 1]
    m_new = jnp.maximum(m_old, jnp.max(cml, axis=-1, keepdims=True))
    acc_ref[:, _L_CML:_L_CML + 1] = (
        jnp.exp(m_old - m_new) * acc_ref[:, _L_CML:_L_CML + 1]
        + jnp.sum(jnp.exp(cml - m_new), axis=-1, keepdims=True))
    acc_ref[:, _M_CML:_M_CML + 1] = m_new
    acc_ref[:, _T_CML:_T_CML + 1] = (
        acc_ref[:, _T_CML:_T_CML + 1] + jnp.where(row_has_tgt, tgt_new * s, 0.0))

    # ---- plain cross-entropy on the pre-computed logits (feat[0]) ------------
    lg = logits_ref[...].astype(jnp.float32)
    if mask_classes:
        lg = jnp.where(col_valid, lg, -1e30)
    tgt_lg = jnp.sum(jnp.where(is_tgt, lg, 0.0), axis=-1, keepdims=True)

    m_old2 = acc_ref[:, _M_CE:_M_CE + 1]
    m_new2 = jnp.maximum(m_old2, jnp.max(lg, axis=-1, keepdims=True))
    acc_ref[:, _L_CE:_L_CE + 1] = (
        jnp.exp(m_old2 - m_new2) * acc_ref[:, _L_CE:_L_CE + 1]
        + jnp.sum(jnp.exp(lg - m_new2), axis=-1, keepdims=True))
    acc_ref[:, _M_CE:_M_CE + 1] = m_new2
    acc_ref[:, _T_CE:_T_CE + 1] = (
        acc_ref[:, _T_CE:_T_CE + 1] + jnp.where(row_has_tgt, tgt_lg, 0.0))

    # ---- finalize (last class tile): per-row combined loss -------------------
    @pl.when(ci == nc - 1)
    def _fin():
        valid = labels != -1
        cml_row = (acc_ref[:, _M_CML:_M_CML + 1]
                   + jnp.log(acc_ref[:, _L_CML:_L_CML + 1])
                   - acc_ref[:, _T_CML:_T_CML + 1])
        ce_row = (acc_ref[:, _M_CE:_M_CE + 1]
                  + jnp.log(acc_ref[:, _L_CE:_L_CE + 1])
                  - acc_ref[:, _T_CE:_T_CE + 1])
        total = lam * ce_row + (1.0 - lam) * cml_row
        rowloss_ref[...] = jnp.where(valid, total, 0.0)


def cross_entropy_combined_margin_loss(logits, feat_fusion, labels, weight, *,
                                       s=64.0, m1=1.0, m2=0.5, m3=0.0, lambda_=0.5,
                                       max_tile_c=2048, interpret=False):
    """Forward of CrossEntropyLoss_CombinedMarginLoss_Optim. Returns (total_loss, logits)."""
    B, D = feat_fusion.shape
    C, D2 = weight.shape
    assert D == D2
    assert logits.shape == (B, C)
    assert labels.shape == (B,)

    if m1 == 1.0 and m3 == 0.0:
        use_arcface = True
    elif m3 > 0:
        use_arcface = False
    else:
        raise ValueError("Unsupported margin values.")

    # ---- generation-aware VMEM budgets (v5e/v6e: 128 MiB, v7x: 64 MiB / TC) --
    try:
        vmem_cap = int(pltpu.get_tpu_info().vmem_capacity_bytes)
    except Exception:
        vmem_cap = 128 * 1024 * 1024
    small_vmem = vmem_cap <= 64 * 1024 * 1024
    class_budget = (20 if small_vmem else 56) * 1024 * 1024
    vmem_cap_limit = (40 if small_vmem else 96) * 1024 * 1024

    # ---- tile selection -------------------------------------------------------
    if B < 8:
        tile_b = B
    else:
        tile_b = (min(B, 128 if small_vmem else 256) // 8) * 8
        if small_vmem and B >= 16 and pl.cdiv(B, tile_b) < 2:
            # v7x: guarantee >= 2 batch tiles so both TensorCores get work.
            tile_b = max(8, _round_up((B + 1) // 2, 8))
    tile_c = _pick_tile_c(C, D, tile_b, class_budget, max_tile_c)

    nb = pl.cdiv(B, tile_b)
    nc = pl.cdiv(C, tile_c)
    mask_classes = (C % tile_c) != 0

    # ---- one-pass weight pre-normalization (f32 math -> bf16 MXU operand) ----
    w32 = weight.astype(jnp.float32)
    w_inv = jax.lax.rsqrt(jnp.maximum(jnp.sum(w32 * w32, axis=-1, keepdims=True), 1e-24))
    w_n = (w32 * w_inv).astype(jnp.bfloat16)

    # Only the tiny label column is materialized/padded; W and logits pass as-is.
    lab_p = jnp.full((nb * tile_b, 1), -1, dtype=jnp.int32).at[:B, 0].set(
        labels.astype(jnp.int32))

    kernel = functools.partial(
        _fused_loss_kernel,
        s=float(s), cos_m=math.cos(m2), sin_m=math.sin(m2), m3=float(m3),
        use_arcface=use_arcface, lam=float(lambda_), c_valid=C, tile_c=tile_c,
        mask_classes=mask_classes)

    vmem_need = (2 * tile_c * D * 2          # bf16 weight tile, double-buffered
                 + 2 * tile_b * tile_c * 4   # logits tile, double-buffered
                 + 2 * tile_b * D * 4        # embedding tile
                 + tile_b * D * 2            # normalized-embedding scratch
                 + (2 << 20))                # accumulators / labels / slack
    vmem_limit = min(vmem_cap_limit, max(32 * 1024 * 1024, vmem_need))

    rowloss = pl.pallas_call(
        kernel,
        grid=(nb, nc),
        in_specs=[
            pl.BlockSpec((tile_b, D), lambda bi, ci: (bi, 0)),         # embeddings
            pl.BlockSpec((tile_c, D), lambda bi, ci: (ci, 0)),         # prenorm bf16 W
            pl.BlockSpec((tile_b, tile_c), lambda bi, ci: (bi, ci)),   # logits (feat[0])
            pl.BlockSpec((tile_b, 1), lambda bi, ci: (bi, 0)),         # labels
        ],
        out_specs=pl.BlockSpec((tile_b, 1), lambda bi, ci: (bi, 0)),
        out_shape=jax.ShapeDtypeStruct((nb * tile_b, 1), jnp.float32),
        scratch_shapes=[
            pltpu.VMEM((tile_b, D), jnp.bfloat16),  # cached normalized embeddings
            pltpu.VMEM((tile_b, 8), jnp.float32),   # packed online-softmax state
        ],
        compiler_params=pltpu.CompilerParams(
            dimension_semantics=("parallel", "arbitrary"),
            vmem_limit_bytes=vmem_limit),
        interpret=interpret,
    )(feat_fusion, w_n, logits, lab_p)

    n_valid = jnp.maximum(jnp.sum((labels != -1).astype(jnp.float32)), 1.0)
    total_loss = jnp.sum(rowloss[:, 0]) / n_valid
    return total_loss, logits


if __name__ == "__main__":
    # Config: feat_dim=32, num_classes=250 (non-multiple of 128 to exercise the
    # ragged-last-block + masking path), ArcFace margins (m1=1, m2=0.5, m3=0),
    # scale 64, lambda_total=0.3.
    B, D, C = 8, 32, 250
    s, m1, m2, m3, lam = 64.0, 1.0, 0.5, 0.0, 0.3

    key = jax.random.PRNGKey(0)
    k1, k2, k3, k4 = jax.random.split(key, 4)
    logits_in = jax.random.normal(k1, (B, C), dtype=jnp.float32)    # feat[0]
    feat_fusion = jax.random.normal(k2, (B, D), dtype=jnp.float32)  # feat[1]
    weight = 0.01 * jax.random.normal(k3, (C, D), dtype=jnp.float32)
    labels = jax.random.randint(k4, (B,), 0, C, dtype=jnp.int32)

    # max_tile_c=128 forces >1 class tile so the streaming logsumexp path runs.
    total_loss, out_logits = cross_entropy_combined_margin_loss(
        logits_in, feat_fusion, labels, weight,
        s=s, m1=m1, m2=m2, m3=m3, lambda_=lam, max_tile_c=128)
    jax.block_until_ready((total_loss, out_logits))

    # ---- pure-JAX reference --------------------------------------------------
    def ref_total():
        emb_n = feat_fusion / jnp.maximum(
            jnp.linalg.norm(feat_fusion, axis=-1, keepdims=True), 1e-12)
        w_nrm = weight / jnp.maximum(
            jnp.linalg.norm(weight, axis=-1, keepdims=True), 1e-12)
        cos = jnp.dot(emb_n.astype(jnp.bfloat16), w_nrm.astype(jnp.bfloat16).T,
                      preferred_element_type=jnp.float32)
        cos = jnp.clip(cos, -1.0, 1.0)
        r = jnp.arange(B)
        tgt = cos[r, labels]
        new_tgt = jnp.cos(jnp.arccos(tgt) + m2)
        marg = cos.at[r, labels].set(new_tgt) * s
        cml = jnp.mean(jax.nn.logsumexp(marg, axis=-1) - marg[r, labels])
        ce = jnp.mean(jax.nn.logsumexp(logits_in, axis=-1) - logits_in[r, labels])
        return lam * ce + (1.0 - lam) * cml

    ref = ref_total()
    assert out_logits.shape == (B, C)
    assert bool(jnp.all(out_logits == logits_in))
    assert jnp.allclose(total_loss, ref, atol=1e-2, rtol=1e-3), (total_loss, ref)
    print("KERNEL_OK")
</pallas_src>

<mosaic_0001>
module attributes {stable_mosaic.version = 11 : i64} {
  func.func @_fused_loss_kernel(%arg0: i32, %arg1: i32, %arg2: memref<8x32xf32, #tpu.memory_space<vmem>>, %arg3: memref<128x32xbf16, #tpu.memory_space<vmem>>, %arg4: memref<8x128xf32, #tpu.memory_space<vmem>>, %arg5: memref<8x1xi32, #tpu.memory_space<vmem>>, %arg6: memref<8x1xf32, #tpu.memory_space<vmem>>, %arg7: memref<8x32xbf16, #tpu.memory_space<vmem>>, %arg8: memref<8x8xf32, #tpu.memory_space<vmem>>) attributes {dimension_semantics = [#tpu.dimension_semantics<parallel>, #tpu.dimension_semantics<arbitrary>], iteration_bounds = array<i64: 1, 2>, scalar_prefetch = 0 : i64, scratch_operands = 2 : i64, tpu.core_type = #tpu.core_type<tc>, window_params = [{transform_indices = @transform_0, window_bounds = array<i64: 8, 32>}, {transform_indices = @transform_1, window_bounds = array<i64: 128, 32>}, {transform_indices = @transform_2, window_bounds = array<i64: 8, 128>}, {transform_indices = @transform_3, window_bounds = array<i64: 8, 1>}, {transform_indices = @transform_4, window_bounds = array<i64: 8, 1>}]} {
    %c0_i32 = arith.constant 0 : i32
    %0 = arith.cmpi eq, %arg1, %c0_i32 : i32
    %1 = arith.extui %0 : i1 to i32
    %c0_i32_0 = arith.constant 0 : i32
    %2 = arith.cmpi ne, %1, %c0_i32_0 : i32
    scf.if %2 {
      %c0_52 = arith.constant 0 : index
      %c0_53 = arith.constant 0 : index
      %104 = vector.load %arg2[%c0_52, %c0_53] : memref<8x32xf32, #tpu.memory_space<vmem>>, vector<8x32xf32>
      %105 = arith.mulf %104, %104 : vector<8x32xf32>
      %cst_54 = arith.constant dense<0.000000e+00> : vector<8xf32>
      %106 = vector.multi_reduction <add>, %105, %cst_54 [1] : vector<8x32xf32> to vector<8xf32>
      %107 = vector.shape_cast %106 : vector<8xf32> to vector<8x1xf32>
      %cst_55 = arith.constant 1.000000e-24 : f32
      %108 = vector.broadcast %cst_55 : f32 to vector<8x1xf32>
      %109 = arith.maximumf %107, %108 : vector<8x1xf32>
      %110 = math.rsqrt %109 : vector<8x1xf32>
      %111 = vector.broadcast %110 : vector<8x1xf32> to vector<8x32xf32>
      %112 = arith.mulf %104, %111 : vector<8x32xf32>
      %113 = arith.truncf %112 : vector<8x32xf32> to vector<8x32xbf16>
      %c0_56 = arith.constant 0 : index
      %c0_57 = arith.constant 0 : index
      %114 = vector.load %arg7[%c0_56, %c0_57] : memref<8x32xbf16, #tpu.memory_space<vmem>>, vector<8x32xbf16>
      tpu.vector_store %arg7[%c0_56, %c0_57], %113 {strides = array<i32>} : memref<8x32xbf16, #tpu.memory_space<vmem>>, vector<8x32xbf16>,
      %115 = tpu.iota {dimensions = array<i32: 1>} : vector<8x8xi32>
      %c0_i32_58 = arith.constant 0 : i32
      %116 = vector.broadcast %c0_i32_58 : i32 to vector<8x8xi32>
      %117 = arith.cmpi eq, %115, %116 : vector<8x8xi32>
      %c3_i32 = arith.constant 3 : i32
      %118 = vector.broadcast %c3_i32 : i32 to vector<8x8xi32>
      %119 = arith.cmpi eq, %115, %118 : vector<8x8xi32>
      %120 = arith.ori %117, %119 : vector<8x8xi1>
      %cst_59 = arith.constant 0xFF800000 : f32
      %cst_60 = arith.constant 0.000000e+00 : f32
      %121 = vector.broadcast %cst_59 : f32 to vector<8x8xf32>
      %122 = vector.broadcast %cst_60 : f32 to vector<8x8xf32>
      %123 = arith.select %120, %121, %122 : vector<8x8xi1>, vector<8x8xf32>
      %c0_61 = arith.constant 0 : index
      %c0_62 = arith.constant 0 : index
      %124 = vector.load %arg8[%c0_61, %c0_62] : memref<8x8xf32, #tpu.memory_space<vmem>>, vector<8x8xf32>
      tpu.vector_store %arg8[%c0_61, %c0_62], %123 {strides = array<i32>} : memref<8x8xf32, #tpu.memory_space<vmem>>, vector<8x8xf32>,
    } else {
    }
    %c0 = arith.constant 0 : index
    %c0_1 = arith.constant 0 : index
    %3 = vector.load %arg5[%c0, %c0_1] : memref<8x1xi32, #tpu.memory_space<vmem>>, vector<8x1xi32>
    %c128_i32 = arith.constant 128 : i32
    %4 = arith.muli %arg1, %c128_i32 : i32
    %5 = vector.broadcast %4 : i32 to vector<8x1xi32>
    %6 = arith.subi %3, %5 : vector<8x1xi32>
    %c0_i32_2 = arith.constant 0 : i32
    %7 = vector.broadcast %c0_i32_2 : i32 to vector<8x1xi32>
    %8 = arith.cmpi sge, %6, %7 : vector<8x1xi32>
    %c128_i32_3 = arith.constant 128 : i32
    %9 = vector.broadcast %c128_i32_3 : i32 to vector<8x1xi32>
    %10 = arith.cmpi slt, %6, %9 : vector<8x1xi32>
    %11 = arith.andi %8, %10 : vector<8x1xi1>
    %c0_4 = arith.constant 0 : index
    %c0_5 = arith.constant 0 : index
    %12 = vector.load %arg7[%c0_4, %c0_5] : memref<8x32xbf16, #tpu.memory_space<vmem>>, vector<8x32xbf16>
    %c0_6 = arith.constant 0 : index
    %c0_7 = arith.constant 0 : index
    %13 = vector.load %arg3[%c0_6, %c0_7] : memref<128x32xbf16, #tpu.memory_space<vmem>>, vector<128x32xbf16>
    %cst = arith.constant dense<0.000000e+00> : vector<8x128xf32>
    %14 = tpu.matmul %12, %13, %cst {dimension_numbers = #tpu.dot_dimension_numbers<[1], [1], [0], [0], [0, 0, 1, 0], [], []>} : vector<8x32xbf16>, vector<128x32xbf16>, vector<8x128xf32> -> vector<8x128xf32>
    %cst_8 = arith.constant -1.000000e+00 : f32
    %cst_9 = arith.constant 1.000000e+00 : f32
    %15 = vector.broadcast %cst_8 : f32 to vector<8x128xf32>
    %16 = arith.maximumf %15, %14 : vector<8x128xf32>
    %17 = vector.broadcast %cst_9 : f32 to vector<8x128xf32>
    %18 = arith.minimumf %17, %16 : vector<8x128xf32>
    %19 = tpu.iota {dimensions = array<i32: 1>} : vector<8x128xi32>
    %20 = vector.broadcast %6 : vector<8x1xi32> to vector<8x128xi32>
    %21 = arith.cmpi eq, %19, %20 : vector<8x128xi32>
    %c128_i32_10 = arith.constant 128 : i32
    %22 = arith.muli %arg1, %c128_i32_10 : i32
    %c250_i32 = arith.constant 250 : i32
    %23 = arith.subi %c250_i32, %22 : i32
    %24 = vector.broadcast %23 : i32 to vector<8x128xi32>
    %25 = arith.cmpi slt, %19, %24 : vector<8x128xi32>
    %cst_11 = arith.constant 0.000000e+00 : f32
    %26 = vector.broadcast %cst_11 : f32 to vector<8x128xf32>
    %27 = arith.select %21, %18, %26 : vector<8x128xi1>, vector<8x128xf32>
    %cst_12 = arith.constant dense<0.000000e+00> : vector<8xf32>
    %28 = vector.multi_reduction <add>, %27, %cst_12 [1] : vector<8x128xf32> to vector<8xf32>
    %29 = vector.shape_cast %28 : vector<8xf32> to vector<8x1xf32>
    %30 = arith.mulf %29, %29 : vector<8x1xf32>
    %cst_13 = arith.constant 1.000000e+00 : f32
    %31 = vector.broadcast %cst_13 : f32 to vector<8x1xf32>
    %32 = arith.subf %31, %30 : vector<8x1xf32>
    %cst_14 = arith.constant 0.000000e+00 : f32
    %cst_15 = arith.constant 1.000000e+00 : f32
    %33 = vector.broadcast %cst_14 : f32 to vector<8x1xf32>
    %34 = arith.maximumf %33, %32 : vector<8x1xf32>
    %35 = vector.broadcast %cst_15 : f32 to vector<8x1xf32>
    %36 = arith.minimumf %35, %34 : vector<8x1xf32>
    %37 = math.sqrt %36 : vector<8x1xf32>
    %cst_16 = arith.constant 0.87758255 : f32
    %38 = vector.broadcast %cst_16 : f32 to vector<8x1xf32>
    %39 = arith.mulf %29, %38 : vector<8x1xf32>
    %cst_17 = arith.constant 0.47942555 : f32
    %40 = vector.broadcast %cst_17 : f32 to vector<8x1xf32>
    %41 = arith.mulf %37, %40 : vector<8x1xf32>
    %42 = arith.subf %39, %41 : vector<8x1xf32>
    %43 = vector.shape_cast %42 : vector<8x1xf32> to vector<8x1xf32>
    %44 = vector.broadcast %43 : vector<8x1xf32> to vector<8x128xf32>
    %45 = arith.select %21, %44, %18 : vector<8x128xi1>, vector<8x128xf32>
    %cst_18 = arith.constant 6.400000e+01 : f32
    %46 = vector.broadcast %cst_18 : f32 to vector<8x128xf32>
    %47 = arith.mulf %45, %46 : vector<8x128xf32>
    %cst_19 = arith.constant -1.000000e+30 : f32
    %48 = vector.broadcast %cst_19 : f32 to vector<8x128xf32>
    %49 = arith.select %25, %47, %48 : vector<8x128xi1>, vector<8x128xf32>
    %c0_20 = arith.constant 0 : index
    %c0_21 = arith.constant 0 : index
    %50 = vector.load %arg8[%c0_20, %c0_21] : memref<8x8xf32, #tpu.memory_space<vmem>>, vector<8x1xf32>
    %cst_22 = arith.constant dense<0xFF800000> : vector<8xf32>
    %51 = vector.multi_reduction <maximumf>, %49, %cst_22 [1] : vector<8x128xf32> to vector<8xf32>
    %52 = vector.shape_cast %51 : vector<8xf32> to vector<8x1xf32>
    %53 = arith.maximumf %50, %52 : vector<8x1xf32>
    %54 = arith.subf %50, %53 : vector<8x1xf32>
    %55 = math.exp %54 : vector<8x1xf32>
    %c0_23 = arith.constant 0 : index
    %c1 = arith.constant 1 : index
    %56 = vector.load %arg8[%c0_23, %c1] : memref<8x8xf32, #tpu.memory_space<vmem>>, vector<8x1xf32>
    %57 = arith.mulf %55, %56 : vector<8x1xf32>
    %58 = vector.broadcast %53 : vector<8x1xf32> to vector<8x128xf32>
    %59 = arith.subf %49, %58 : vector<8x128xf32>
    %60 = math.exp %59 : vector<8x128xf32>
    %cst_24 = arith.constant dense<0.000000e+00> : vector<8xf32>
    %61 = vector.multi_reduction <add>, %60, %cst_24 [1] : vector<8x128xf32> to vector<8xf32>
    %62 = vector.shape_cast %61 : vector<8xf32> to vector<8x1xf32>
    %63 = arith.addf %57, %62 : vector<8x1xf32>
    %c0_25 = arith.constant 0 : index
    %c1_26 = arith.constant 1 : index
    %64 = vector.load %arg8[%c0_25, %c1_26] : memref<8x8xf32, #tpu.memory_space<vmem>>, vector<8x1xf32>
    tpu.vector_store %arg8[%c0_25, %c1_26], %63 {strides = array<i32>} : memref<8x8xf32, #tpu.memory_space<vmem>>, vector<8x1xf32>,
    %c0_27 = arith.constant 0 : index
    %c0_28 = arith.constant 0 : index
    %65 = vector.load %arg8[%c0_27, %c0_28] : memref<8x8xf32, #tpu.memory_space<vmem>>, vector<8x1xf32>
    tpu.vector_store %arg8[%c0_27, %c0_28], %53 {strides = array<i32>} : memref<8x8xf32, #tpu.memory_space<vmem>>, vector<8x1xf32>,
    %c0_29 = arith.constant 0 : index
    %c2 = arith.constant 2 : index
    %66 = vector.load %arg8[%c0_29, %c2] : memref<8x8xf32, #tpu.memory_space<vmem>>, vector<8x1xf32>
    %cst_30 = arith.constant 6.400000e+01 : f32
    %67 = vector.broadcast %cst_30 : f32 to vector<8x1xf32>
    %68 = arith.mulf %42, %67 : vector<8x1xf32>
    %cst_31 = arith.constant 0.000000e+00 : f32
    %69 = vector.broadcast %cst_31 : f32 to vector<8x1xf32>
    %70 = arith.select %11, %68, %69 : vector<8x1xi1>, vector<8x1xf32>
    %71 = arith.addf %66, %70 : vector<8x1xf32>
    %c0_32 = arith.constant 0 : index
    %c2_33 = arith.constant 2 : index
    %72 = vector.load %arg8[%c0_32, %c2_33] : memref<8x8xf32, #tpu.memory_space<vmem>>, vector<8x1xf32>
    tpu.vector_store %arg8[%c0_32, %c2_33], %71 {strides = array<i32>} : memref<8x8xf32, #tpu.memory_space<vmem>>, vector<8x1xf32>,
    %c0_34 = arith.constant 0 : index
    %c0_35 = arith.constant 0 : index
    %73 = vector.load %arg4[%c0_34, %c0_35] : memref<8x128xf32, #tpu.memory_space<vmem>>, vector<8x128xf32>
    %cst_36 = arith.constant -1.000000e+30 : f32
    %74 = vector.broadcast %cst_36 : f32 to vector<8x128xf32>
    %75 = arith.select %25, %73, %74 : vector<8x128xi1>, vector<8x128xf32>
    %cst_37 = arith.constant 0.000000e+00 : f32
    %76 = vector.broadcast %cst_37 : f32 to vector<8x128xf32>
    %77 = arith.select %21, %75, %76 : vector<8x128xi1>, vector<8x128xf32>
    %cst_38 = arith.constant dense<0.000000e+00> : vector<8xf32>
    %78 = vector.multi_reduction <add>, %77, %cst_38 [1] : vector<8x128xf32> to vector<8xf32>
    %79 = vector.shape_cast %78 : vector<8xf32> to vector<8x1xf32>
    %c0_39 = arith.constant 0 : index
    %c3 = arith.constant 3 : index
    %80 = vector.load %arg8[%c0_39, %c3] : memref<8x8xf32, #tpu.memory_space<vmem>>, vector<8x1xf32>
    %cst_40 = arith.constant dense<0xFF800000> : vector<8xf32>
    %81 = vector.multi_reduction <maximumf>, %75, %cst_40 [1] : vector<8x128xf32> to vector<8xf32>
    %82 = vector.shape_cast %81 : vector<8xf32> to vector<8x1xf32>
    %83 = arith.maximumf %80, %82 : vector<8x1xf32>
    %84 = arith.subf %80, %83 : vector<8x1xf32>
    %85 = math.exp %84 : vector<8x1xf32>
    %c0_41 = arith.constant 0 : index
    %c4 = arith.constant 4 : index
    %86 = vector.load %arg8[%c0_41, %c4] : memref<8x8xf32, #tpu.memory_space<vmem>>, vector<8x1xf32>
    %87 = arith.mulf %85, %86 : vector<8x1xf32>
    %88 = vector.broadcast %83 : vector<8x1xf32> to vector<8x128xf32>
    %89 = arith.subf %75, %88 : vector<8x128xf32>
    %90 = math.exp %89 : vector<8x128xf32>
    %cst_42 = arith.constant dense<0.000000e+00> : vector<8xf32>
    %91 = vector.multi_reduction <add>, %90, %cst_42 [1] : vector<8x128xf32> to vector<8xf32>
    %92 = vector.shape_cast %91 : vector<8xf32> to vector<8x1xf32>
    %93 = arith.addf %87, %92 : vector<8x1xf32>
    %c0_43 = arith.constant 0 : index
    %c4_44 = arith.constant 4 : index
    %94 = vector.load %arg8[%c0_43, %c4_44] : memref<8x8xf32, #tpu.memory_space<vmem>>, vector<8x1xf32>
    tpu.vector_store %arg8[%c0_43, %c4_44], %93 {strides = array<i32>} : memref<8x8xf32, #tpu.memory_space<vmem>>, vector<8x1xf32>,
    %c0_45 = arith.constant 0 : index
    %c3_46 = arith.constant 3 : index
    %95 = vector.load %arg8[%c0_45, %c3_46] : memref<8x8xf32, #tpu.memory_space<vmem>>, vector<8x1xf32>
    tpu.vector_store %arg8[%c0_45, %c3_46], %83 {strides = array<i32>} : memref<8x8xf32, #tpu.memory_space<vmem>>, vector<8x1xf32>,
    %c0_47 = arith.constant 0 : index
    %c5 = arith.constant 5 : index
    %96 = vector.load %arg8[%c0_47, %c5] : memref<8x8xf32, #tpu.memory_space<vmem>>, vector<8x1xf32>
    %cst_48 = arith.constant 0.000000e+00 : f32
    %97 = vector.broadcast %cst_48 : f32 to vector<8x1xf32>
    %98 = arith.select %11, %79, %97 : vector<8x1xi1>, vector<8x1xf32>
    %99 = arith.addf %96, %98 : vector<8x1xf32>
    %c0_49 = arith.constant 0 : index
    %c5_50 = arith.constant 5 : index
    %100 = vector.load %arg8[%c0_49, %c5_50] : memref<8x8xf32, #tpu.memory_space<vmem>>, vector<8x1xf32>
    tpu.vector_store %arg8[%c0_49, %c5_50], %99 {strides = array<i32>} : memref<8x8xf32, #tpu.memory_space<vmem>>, vector<8x1xf32>,
    %c1_i32 = arith.constant 1 : i32
    %101 = arith.cmpi eq, %arg1, %c1_i32 : i32
    %102 = arith.extui %101 : i1 to i32
    %c0_i32_51 = arith.constant 0 : i32
    %103 = arith.cmpi ne, %102, %c0_i32_51 : i32
    scf.if %103 {
      %c-1_i32 = arith.constant -1 : i32
      %104 = vector.broadcast %c-1_i32 : i32 to vector<8x1xi32>
      %105 = arith.cmpi ne, %3, %104 : vector<8x1xi32>
      %c0_52 = arith.constant 0 : index
      %c0_53 = arith.constant 0 : index
      %106 = vector.load %arg8[%c0_52, %c0_53] : memref<8x8xf32, #tpu.memory_space<vmem>>, vector<8x1xf32>
      %c0_54 = arith.constant 0 : index
      %c1_55 = arith.constant 1 : index
      %107 = vector.load %arg8[%c0_54, %c1_55] : memref<8x8xf32, #tpu.memory_space<vmem>>, vector<8x1xf32>
      %108 = math.log %107 : vector<8x1xf32>
      %109 = arith.addf %106, %108 : vector<8x1xf32>
      %c0_56 = arith.constant 0 : index
      %c2_57 = arith.constant 2 : index
      %110 = vector.load %arg8[%c0_56, %c2_57] : memref<8x8xf32, #tpu.memory_space<vmem>>, vector<8x1xf32>
      %111 = arith.subf %109, %110 : vector<8x1xf32>
      %c0_58 = arith.constant 0 : index
      %c3_59 = arith.constant 3 : index
      %112 = vector.load %arg8[%c0_58, %c3_59] : memref<8x8xf32, #tpu.memory_space<vmem>>, vector<8x1xf32>
      %c0_60 = arith.constant 0 : index
      %c4_61 = arith.constant 4 : index
      %113 = vector.load %arg8[%c0_60, %c4_61] : memref<8x8xf32, #tpu.memory_space<vmem>>, vector<8x1xf32>
      %114 = math.log %113 : vector<8x1xf32>
      %115 = arith.addf %112, %114 : vector<8x1xf32>
      %c0_62 = arith.constant 0 : index
      %c5_63 = arith.constant 5 : index
      %116 = vector.load %arg8[%c0_62, %c5_63] : memref<8x8xf32, #tpu.memory_space<vmem>>, vector<8x1xf32>
      %117 = arith.subf %115, %116 : vector<8x1xf32>
      %cst_64 = arith.constant 3.000000e-01 : f32
      %118 = vector.broadcast %cst_64 : f32 to vector<8x1xf32>
      %119 = arith.mulf %118, %117 : vector<8x1xf32>
      %cst_65 = arith.constant 0.699999988 : f32
      %120 = vector.broadcast %cst_65 : f32 to vector<8x1xf32>
      %121 = arith.mulf %120, %111 : vector<8x1xf32>
      %122 = arith.addf %119, %121 : vector<8x1xf32>
      %cst_66 = arith.constant 0.000000e+00 : f32
      %123 = vector.broadcast %cst_66 : f32 to vector<8x1xf32>
      %124 = arith.select %105, %122, %123 : vector<8x1xi1>, vector<8x1xf32>
      %c0_67 = arith.constant 0 : index
      %c0_68 = arith.constant 0 : index
      %125 = vector.load %arg6[%c0_67, %c0_68] : memref<8x1xf32, #tpu.memory_space<vmem>>, vector<8x1xf32>
      tpu.vector_store %arg6[%c0_67, %c0_68], %124 {strides = array<i32>} : memref<8x1xf32, #tpu.memory_space<vmem>>, vector<8x1xf32>,
    } else {
    }
    return
  }
  func.func @transform_0(%arg0: i32, %arg1: i32) -> (i32, i32) {
    %c0_i32 = arith.constant 0 : i32
    %c0_i32_0 = arith.constant 0 : i32
    return %arg0, %c0_i32 : i32, i32
  }
  func.func @transform_1(%arg0: i32, %arg1: i32) -> (i32, i32) {
    %c0_i32 = arith.constant 0 : i32
    %c0_i32_0 = arith.constant 0 : i32
    return %arg1, %c0_i32 : i32, i32
  }
  func.func @transform_2(%arg0: i32, %arg1: i32) -> (i32, i32) {
    %c0_i32 = arith.constant 0 : i32
    return %arg0, %arg1 : i32, i32
  }
  func.func @transform_3(%arg0: i32, %arg1: i32) -> (i32, i32) {
    %c0_i32 = arith.constant 0 : i32
    %c0_i32_0 = arith.constant 0 : i32
    return %arg0, %c0_i32 : i32, i32
  }
  func.func @transform_4(%arg0: i32, %arg1: i32) -> (i32, i32) {
    %c0_i32 = arith.constant 0 : i32
    %c0_i32_0 = arith.constant 0 : i32
    return %arg0, %c0_i32 : i32, i32
  }
}

</mosaic_0001>

<bundles_post_ra>
// kernel: tpu_custom_call.1
= control target key start
LH: loop header
LB: loop body
LE: loop exit
PB: predicated region body
PF: predicated region fallthrough
CT: control target
= control target key end

     0   :  { %s843_s15 = smov 0   ;;  %s845_s16 = smov 0   ;;  %s957_s0 = inlined_call_operand.vmem [shape: f32[8,32], index: 0, kind: input, shape index: {}]   ;;  %s958_s1 = inlined_call_operand.vmem [shape: bf16[250,32], index: 1, kind: input, shape index: {}]   ;;  %s959_s2 = inlined_call_operand.vmem [shape: f32[8,250], index: 2, kind: input, shape index: {}]   ;;  %s960_s3 = inlined_call_operand.vmem [shape: s32[8,1], index: 3, kind: input, shape index: {}]   ;;  %s961_s4 = inlined_call_operand.vmem [shape: f32[8,1], index: 4, kind: output, shape index: {}]  }
   0x1   :  { %s847_s17 = smov 0  }
   0x2 LB: > { %s23_s18 = sadd.s32 1, %s801_s16  ;;  %p678_p0 = scmp.ge.s32.totalorder %s805_s17, 1  ;;  %s805_s17 = sphi %s847_s17, %s14_s17   ;;  %s801_s16 = sphi %s845_s16, %s967_s16   ;;  %s797_s15 = sphi %s843_s15, %s966_s15  }
   0x3   : > { %p24_p1 = scmp.ge.s32.totalorder %s23_s18, 2  ;;  %p208_p2 = scmp.lt.s32.totalorder %s805_s17, 3 }
   0x5   : > { %s969_s18 = smov (%p24_p1, %s23_s18), 0  ;;  %p209_p3 = pnand %p678_p0, %p208_p2 }
   0x6   : > { %s679_s19 = sshll.u32 (!%p209_p3), %s797_s15, 4  ;;  %p261_p4 = scmp.lt.s32.totalorder (!%p209_p3), %s797_s15, 1 }
   0x7   : > { %212 = sbr.rel (%p209_p3) target bundleno = 1756 (0x6dc), region = 36  ;;  %p254_p5 = scmp.lt.s32.totalorder (!%p209_p3), %s679_s19, 31 }
   0x8   : > { %p682_p6 = scmp.ne.s32.totalorder (!%p209_p3), %s797_s15, 0 }
   0xc   : > { %s262_s20 = scalar_select %p261_p4, %s797_s15, 1 }
   0xd   : > { %s971_s19 = smov (!%p254_p5, %s679_s19), 31  ;;  %278 = sbr.rel (%p682_p6) target bundleno = 163 (0xa3), region = 40 }
   0xe   : > { %s681_s21 = sshll.u32 %s262_s20, 3  ;;  %s680_s22 = sshll.u32 %s971_s19, 2 }
   0xf   : > { %s869_s25 = scalar_lea.vmem %s959_s2, %s681_s21  ;;  %s874_s28 = scalar_lea.vmem %s958_s1, %s680_s22 }
  0x12   : > { %v279_v0 = vld [vmem:[%s957_s0] sm:$0xff]  ;;  %vm281_vm0 = vcmask 261120   ;;  %v300_v3 = vlaneseq  ;;  %v807_v5 = vmov 0.0   ;;  %vm306_vm4 = vcmask 64512  }
  0x13   : > { %v280_v1 = vmul.f32 %v279_v0, %v279_v0  ;;  %vm298_vm8 = vcmask 257024  }
  0x14   : > { %v301_v4 = vand.u32 127, %v300_v3 }
  0x15   : > { %v282_v2 = vsel %vm281_vm0, %v280_v1, 0.0 }
  0x16   : > { %283 = vadd.xlane.f32.xlu0 %v282_v2  ;;  %vm302_vm1 = vcmp.eq.s32.totalorder %v301_v4, 0  ;;  %vm303_vm2 = vcmp.eq.s32.totalorder %v301_v4, 3 }
  0x17   : > { %vm304_vm3 = vmor %vm302_vm1, %vm303_vm2 }
  0x18   : > { %v305_v6 = vsel %vm304_vm3, -inf, %v807_v5 }
  0x19   : > { %307 = vst.msk [vmem:[#allocation3] sm:$0xff] %vm306_vm4, %v305_v6 }
  0x89   : > { %v284_v7 = vpop.xlane.xlu0 %283 }
  0x8a   : > { %v285_v8 = vmax.f32 %v284_v7, 1e-24 }
  0x8c   : > { %765 = vrsqrt.f32 %v285_v8  ;;  %vm292_vm6 = vweird.f32 %v285_v8 }
  0x92   : > { %v766_v9 = vpop.eup %765 }
  0x93   : > { %v287_v10 = vmul.f32 %v766_v9, %v285_v8  ;;  %vm293_vm5 = vweird.f32 %v766_v9 }
  0x94   : > { %vm294_vm7 = vmor %vm292_vm6, %vm293_vm5 }
  0x95   : > { %v288_v11 = vmul.f32 %v766_v9, %v287_v10 }
  0x97   : > { %v289_v12 = vmul.f32 0.5, %v288_v11 }
  0x99   : > { %v290_v13 = vsub.f32 1.5, %v289_v12 }
  0x9b   : > { %v291_v14 = vmul.f32 %v766_v9, %v290_v13 }
  0x9d   : > { %v295_v15 = vsel %vm294_vm7, %v766_v9, %v291_v14 }
  0x9e   : > { %v296_v16 = vmul.f32 %v295_v15, %v279_v0 }
  0xa0   : > { %v297_v17 = vpack.c.bf16 %v296_v16, %v296_v16 }
  0xa2   : > { %299 = vst.msk [vmem:[#allocation2] sm:$0xf] %vm298_vm8, %v297_v17 }
  0xa3 PF: > { %v729_v18 = vld [vmem:[%s874_s28 + $0x38] sm:$0xff]  ;;  %vm372_vm9 = vcmask 261120   ;;  %v728_v20 = vld [vmem:[%s874_s28 + $0x30] sm:$0xff]  ;;  %v727_v22 = vld [vmem:[%s874_s28 + $0x28] sm:$0xff]  ;;  %s683_s5 = sshll.u32 %s797_s15, 7  ;;  %v808_v30 = vmov 0   ;;  %v415_v39 = vlaneseq }
  0xa4   : > { %v398_v19 = vsel %vm372_vm9, %v729_v18, 0  ;;  %v395_v21 = vsel %vm372_vm9, %v728_v20, 0  ;;  %v392_v23 = vsel %vm372_vm9, %v727_v22, 0  ;;  %v726_v24 = vld [vmem:[%s874_s28 + $0x20] sm:$0xff]  ;;  %v725_v26 = vld [vmem:[%s874_s28 + $0x18] sm:$0xff]  ;;  %v310_v29 = vstv %s683_s5  ;;  %767 = vset.pattern.permute.xlu0 %v808_v30  ;;  %v724_v32 = vld [vmem:[%s874_s28 + $0x10] sm:$0xff]  ;;  %768 = vset.pattern.permute.xlu1 %v808_v30 }
  0xa5   : > { %400 = vmatpush.bf16.xpose.msra.mxu0 %v398_v19  ;;  %v389_v25 = vsel %vm372_vm9, %v726_v24, 0  ;;  %v386_v27 = vsel %vm372_vm9, %v725_v26, 0  ;;  %v894_v28 = vld [vmem:[%s960_s3] sm:$0xff]  ;;  %v383_v33 = vsel %vm372_vm9, %v724_v32, 0  ;;  %v723_v34 = vld [vmem:[%s874_s28 + $0x8] sm:$0xff]  ;;  %s421_s8 = ssub.s32 250, %s683_s5 }
  0xa6   : > { %v311_v31 = vsub.s32 %v894_v28, %v310_v29  ;;  %v380_v35 = vsel %vm372_vm9, %v723_v34, 0  ;;  %v722_v36 = vld [vmem:[%s874_s28] sm:$0xff]  ;;  %v904_v40 = vand.u32 127, %v415_v39  ;;  %v422_v41 = vstv %s421_s8  ;;  %s809_s9 = smov 127   ;;  %s810_s10 = smov 2  }
  0xa7   : > { %v377_v37 = vsel %vm372_vm9, %v722_v36, 0  ;;  %v449_v52 = vld [vmem:[#allocation3] sm:$0xff]  ;;  %s811_s11 = smov 1   ;;  %vm476_vm1 = vcmask 15368   ;;  %vm478_vm2 = vcmask 7168   ;;  %vm488_vm3 = vcmask 23568  }
  0xa8   : > { %418 = vperm.xlu0 %767, %v311_v31   ;;  %vm907_vm10 = vcmp.lt.s32.totalorder %v904_v40, %v422_v41  ;;  %457 = vrot.lane.b32.xlu2 %v449_v52, %s809_s9  ;;  %vm312_vm14 = vcmp.ge.s32.totalorder %v311_v31, 0  ;;  %vm313_vm15 = vcmp.lt.s32.totalorder %v311_v31, 128  ;;  %v490_v22 = vld [vmem:[%s869_s25] sm:$0xff]  ;;  %v812_v29 = vmov 3   ;;  %s813_s12 = smov 5   ;;  %p718_p7 = scmp.ne.s32.totalorder %s797_s15, 1 }
  0xa9   : > { %v315_v38 = vld [vmem:[#allocation2] sm:$0xf]  ;;  %vm924_vm0 = vmand %vm312_vm14, %vm313_vm15  ;;  %769 = vset.pattern.permute.xlu2 %v812_v29  ;;  %vm522_vm4 = vcmask 39968   ;;  %vm524_vm5 = vcmask 31768   ;;  %vm533_vm6 = vcmask 48168   ;;  %s814_s13 = smov (!%p718_p7), 127  }
  0xaa   : > { %s815_s14 = smov (!%p718_p7), 126   ;;  %s816_s19 = smov (!%p718_p7), 3  }
  0xab   : > { %s817_s15 = smov (!%p718_p7), 125  }
  0xad   : > { %401 = vmatpush.bf16.xpose.msra.mxu0 %v395_v21 }
  0xb0   : > { %770 = vset.pattern.permute.xlu0 %v812_v29 }
  0xb5   : > { %402 = vmatpush.bf16.xpose.msra.mxu0 %v392_v23  ;;  %v491_v23 = vsel %vm907_vm10, %v490_v22, -1e+30 }
  0xbd   : > { %403 = vmatpush.bf16.xpose.msra.mxu0 %v389_v25 }
  0xc5   : > { %404 = vmatpush.bf16.xpose.msra.mxu0 %v386_v27 }
  0xcd   : > { %405 = vmatpush.bf16.xpose.msra.mxu0 %v383_v33 }
  0xd5   : > { %406 = vmatpush.bf16.xpose.msra.mxu0 %v380_v35 }
  0xdd   : > { %407 = vmatpush.bf16.xpose.msra.mxu0 %v377_v37 }
  0xe4   : > { %716 = vmatmul.msk.bf16.vlgmr.msra.gmra.mxu0 %vm372_vm9, %v315_v38 }
 0x102   : > { %v458_v17 = vpop.permute.xlu2 %457 }
 0x11a   : > { %v911_v43 = vpop.permute.xlu0 %418 }
 0x11b   : > { %vm420_vm11 = vcmp.eq.s32.totalorder %v904_v40, %v911_v43 }
 0x11c   : > { %v492_v33 = vsel %vm420_vm11, %v491_v23, 0.0 }
 0x161   : > { %v409_v44 = vpop.f32.mrf.mxu0 }
 0x162   : > { %v717_v45 = vclamps-f32 %v409_v44, 1.0 }
 0x164   : > { %v424_v46 = vsel %vm420_vm11, %v717_v45, 0.0 }
 0x165   : > { %425 = vadd.xlane.f32.xlu0 %v424_v46 }
 0x169   : > { %v411_v47 = vpop.f32.mrf.mxu0 }
 0x1d8   : > { %v426_v48 = vpop.xlane.xlu0 %425 }
 0x1d9   : > { %v427_v49 = vmul.f32 %v426_v48, %v426_v48  ;;  %v443_v0 = vmul.f32 0.87758255, %v426_v48 }
 0x1db   : > { %v428_v50 = vsub.f32 1.0, %v427_v49 }
 0x1dd   : > { %v429_v51 = vmax.f32 %v428_v50, 0.0 }
 0x1df   : > { %v430_v53 = vmin.f32 %v429_v51, 1.0 }
 0x1e1   : > { %771 = vrsqrt.f32 %v430_v53  ;;  %vm438_vm12 = vcmp.eq.f32.partialorder %v430_v53, inf  ;;  %v441_v61 = vand.u32 2147483648, %v430_v53  ;;  %vm440_vm13 = vcmp.eq.f32.partialorder %v430_v53, 0.0 }
 0x1e7   : > { %v772_v54 = vpop.eup %771 }
 0x1e8   : > { %v432_v55 = vmul.f32 %v772_v54, %v430_v53 }
 0x1ea   : > { %v433_v56 = vmul.f32 %v772_v54, %v432_v55 }
 0x1ec   : > { %v434_v57 = vmul.f32 0.5, %v433_v56 }
 0x1ee   : > { %v435_v58 = vsub.f32 1.5, %v434_v57 }
 0x1f0   : > { %v436_v59 = vmul.f32 %v772_v54, %v435_v58 }
 0x1f2   : > { %v437_v60 = vmul.f32 %v436_v59, %v430_v53 }
 0x1f4   : > { %v439_v62 = vsel %vm438_vm12, %v430_v53, %v437_v60 }
 0x1f5   : > { %v442_v63 = vsel %vm440_vm13, %v441_v61, %v439_v62 }
 0x1f6   : > { %v444_v1 = vmul.f32 0.47942555, %v442_v63 }
 0x1f8   : > { %v445_v2 = vsub.f32 %v443_v0, %v444_v1 }
 0x1fa   : > { %v446_v3 = vsel %vm420_vm11, %v445_v2, %v717_v45  ;;  %v481_v8 = vmul.f32 64.0, %v445_v2 }
 0x1fb   : > { %v447_v4 = vmul.f32 64.0, %v446_v3 }
 0x1fc   : > { %v482_v10 = vsel %vm924_vm0, %v481_v8, 0.0 }
 0x1fd   : > { %v448_v5 = vsel %vm907_vm10, %v447_v4, -1e+30 }
 0x1fe   : > { %450 = vmax.xlane.f32.xlu1 %v448_v5 }
 0x271   : > { %v451_v6 = vpop.xlane.xlu1 %450 }
 0x272   : > { %v452_v7 = vmax.f32 %v449_v52, %v451_v6 }
 0x274   : > { %463 = vperm.xlu1 %768, %v452_v7   ;;  %v453_v15 = vsub.f32 %v449_v52, %v452_v7 }
 0x276   : > { %v454_v16 = vmul.f32 1.442695, %v453_v15 }
 0x27c   : > { %484 = vrot.lane.b32.xlu1 %v482_v10, %s810_s10 }
 0x2e6   : > { %v464_v11 = vpop.permute.xlu1 %463 }
 0x2e7   : > { %v466_v12 = vsub.f32 %v448_v5, %v464_v11 }
 0x2e9   : > { %v467_v13 = vmul.f32 1.442695, %v466_v12 }
 0x2eb   : > { %773 = vpow2.f32 %v467_v13 }
 0x2ec   : > { %775 = vpow2.f32 %v454_v16 }
 0x2ee   : > { %v485_v24 = vpop.permute.xlu1 %484 }
 0x2f1   : > { %v774_v14 = vpop.eup %773 }
 0x2f2   : > { %469 = vadd.xlane.f32.xlu2 %v774_v14  ;;  %v776_v18 = vpop.eup %775 }
 0x2f3   : > { %v460_v19 = vmul.f32 %v776_v18, %v458_v17 }
 0x365   : > { %v470_v20 = vpop.xlane.xlu2 %469 }
 0x366   : > { %v471_v21 = vadd.f32 %v470_v20, %v460_v19 }
 0x368   : > { %473 = vrot.lane.b32.xlu1 %v471_v21, %s811_s11 }
 0x392   : > { %496 = vmax.xlane.f32.xlu1 %v491_v23 }
 0x3da   : > { %v474_v25 = vpop.permute.xlu1 %473 }
 0x3db   : > { %477 = vst.msk [vmem:[#allocation3] sm:$0xff] %vm476_vm1, %v474_v25 }
 0x3dc   : > { %479 = vst.msk [vmem:[#allocation3] sm:$0xff] %vm478_vm2, %v452_v7 }
 0x3e3   : > { %v480_v26 = vld [vmem:[#allocation3] sm:$0xff] }
 0x3e4   : > { %v487_v27 = vadd.f32 %v485_v24, %v480_v26 }
 0x3e6   : > { %489 = vst.msk [vmem:[#allocation3] sm:$0xff] %vm488_vm3, %v487_v27 }
 0x3ed   : > { %v495_v30 = vld [vmem:[#allocation3] sm:$0xff] }
 0x3ee   : > { %503 = vrot.lane.b32.xlu0 %v495_v30, %s809_s9 }
 0x405   : > { %v497_v31 = vpop.xlane.xlu1 %496 }
 0x406   : > { %v498_v32 = vmax.f32 %v495_v30, %v497_v31 }
 0x408   : > { %509 = vperm.xlu2 %769, %v498_v32   ;;  %v499_v41 = vsub.f32 %v495_v30, %v498_v32 }
 0x40a   : > { %v500_v42 = vmul.f32 1.442695, %v499_v41 }
 0x431   : > { %493 = vadd.xlane.f32.xlu2 %v492_v33 }
 0x460   : > { %v504_v44 = vpop.permute.xlu0 %503 }
 0x462   : > { %v510_v34 = vpop.permute.xlu2 %509 }
 0x463   : > { %v512_v35 = vsub.f32 %v491_v23, %v510_v34 }
 0x465   : > { %v513_v36 = vmul.f32 1.442695, %v512_v35 }
 0x467   : > { %777 = vpow2.f32 %v513_v36 }
 0x468   : > { %779 = vpow2.f32 %v500_v42 }
 0x46d   : > { %v778_v37 = vpop.eup %777 }
 0x46e   : > { %515 = vadd.xlane.f32.xlu0 %v778_v37  ;;  %v780_v45 = vpop.eup %779 }
 0x46f   : > { %v506_v40 = vmul.f32 %v780_v45, %v504_v44 }
 0x4a4   : > { %v494_v38 = vpop.xlane.xlu2 %493 }
 0x4a5   : > { %v527_v39 = vsel %vm924_vm0, %v494_v38, 0.0 }
 0x4a6   : > { %529 = vrot.lane.b32.xlu0 %v527_v39, %s813_s12 }
 0x4e1   : > { %v516_v43 = vpop.xlane.xlu0 %515 }
 0x4e2   : > { %v517_v46 = vadd.f32 %v516_v43, %v506_v40 }
 0x4e4   : > { %519 = vrot.lane.b32.xlu1 %v517_v46, %s811_s11 }
 0x518   : > { %v530_v48 = vpop.permute.xlu0 %529 }
 0x556   : > { %v520_v47 = vpop.permute.xlu1 %519 }
 0x557   : > { %523 = vst.msk [vmem:[#allocation3] sm:$0xff] %vm522_vm4, %v520_v47 }
 0x558   : > { %525 = vst.msk [vmem:[#allocation3] sm:$0xff] %vm524_vm5, %v498_v32 }
 0x55e   : > { %538 = sbr.rel (%p718_p7) target bundleno = 1756 (0x6dc), region = 44 }
 0x55f   : > { %v526_v49 = vld [vmem:[#allocation3] sm:$0xff] }
 0x560   : > { %v532_v50 = vadd.f32 %v530_v48, %v526_v49 }
 0x562   : > { %534 = vst.msk [vmem:[#allocation3] sm:$0xff] %vm533_vm6, %v532_v50 }
 0x563   : > { %vm539_vm7 = vcmp.ne.s32.totalorder %v894_v28, 4294967295 }
 0x569   : > { %v540_v51 = vld [vmem:[#allocation3] sm:$0xff] }
 0x56a   : > { %781 = vlog2.f32 %v540_v51 }
 0x570   : > { %v782_v52 = vpop.eup %781 }
 0x571   : > { %v542_v53 = vmul.f32 0.6931472, %v782_v52 }
 0x573   : > { %544 = vrot.lane.b32.xlu0 %v542_v53, %s814_s13 }
 0x57b   : > { %549 = vrot.lane.b32.xlu0 %v540_v51, %s815_s14 }
 0x5e5   : > { %v545_v54 = vpop.permute.xlu0 %544 }
 0x5e6   : > { %v547_v55 = vadd.f32 %v545_v54, %v540_v51 }
 0x5ed   : > { %v550_v56 = vpop.permute.xlu0 %549 }
 0x5ee   : > { %v552_v57 = vsub.f32 %v547_v55, %v550_v56 }
 0x5f0   : > { %v554_v58 = vmul.f32 0.7, %v552_v57  ;;  %v553_v59 = vmul.f32 0.3, %v552_v57 }
 0x5f2   : > { %556 = vrot.lane.b32.xlu1 %v554_v58, %s816_s19 }
 0x664   : > { %v557_v60 = vpop.permute.xlu1 %556 }
 0x665   : > { %v559_v61 = vadd.f32 %v557_v60, %v553_v59 }
 0x667   : > { %561 = vrot.lane.b32.xlu1 %v559_v61, %s817_s15 }
 0x6d9   : > { %v562_v62 = vpop.permute.xlu1 %561 }
 0x6da   : > { %v564_v63 = vsel %vm539_vm7, %v562_v62, 0.0 }
 0x6db   : > { %565 = vst.msk [vmem:[%s961_s4] sm:$0xff] %vm478_vm2, %v564_v63 }
 0x6dc PF: > { %s14_s17 = sadd.s32 1, %s805_s17   ;;  %s966_s15 = smov %s801_s16 }
 0x6dd   : > { %p11_p8 = scmp.ge.s32.totalorder %s14_s17, 4   ;;  %s967_s16 = smov %s969_s18 }
 0x6df   :  { %13 = sbr.rel (!%p11_p8) target bundleno = 2 (0x2), region = 83 }

</bundles_post_ra>
